<compile_context>
chip_gen: v7x
topology: tpu7x:2x2x1
jax: 0.10.0
libtpu: 0.0.40
codegen_flags: <defaults>
</compile_context>

<pallas_src>
import jax
import jax.numpy as jnp
from jax.experimental import pallas as pl
from jax.experimental.pallas import tpu as pltpu


def diffmodel_kernel(x_ref, wbs_ref, bb_ref, wfc0_ref, bfc0_ref, out_ref, acc_ref):
    # x_ref: [bt, 2C, hw_t], wbs_ref: [C, F] (pre-scaled by 1/HW), bb_ref: [1, F],
    # wfc0_ref: [4F, 1], bfc0_ref: [1, 1], out_ref: [bt, 128], acc_ref: [bt, 2C]
    k = pl.program_id(1)

    @pl.when(k == 0)
    def _init():
        acc_ref[...] = jnp.zeros_like(acc_ref)

    # Partial spatial sum for this HW tile (hides under the pipelined DMA).
    acc_ref[...] += jnp.sum(x_ref[...], axis=-1)

    @pl.when(k == pl.num_programs(1) - 1)
    def _finalize():
        pooled = acc_ref[...]                       # [bt, 2C] (sum over H*W)
        C = wbs_ref.shape[0]
        # Synthetic backbone: GAP + Linear (wbs already carries the 1/HW scale).
        feat1 = jnp.dot(pooled[:, :C], wbs_ref[...],
                        preferred_element_type=jnp.float32) + bb_ref[...]
        feat2 = jnp.dot(pooled[:, C:], wbs_ref[...],
                        preferred_element_type=jnp.float32) + bb_ref[...]

        # DiffModel feature combination (diff_only=False).
        l1 = jnp.abs(feat1 - feat2)
        l2 = l1 * l1
        ad = feat1 + feat2
        mu = feat1 * feat2

        # fc(cat([l1, l2, ad, mu], dim=1)) restricted to class column 0,
        # computed as a sum of 4 partial matmuls (no in-kernel lane concat).
        F_ = feat1.shape[1]
        w = wfc0_ref[...]                           # [4F, 1]
        logit = (jnp.dot(l1, w[0 * F_:1 * F_], preferred_element_type=jnp.float32)
                 + jnp.dot(l2, w[1 * F_:2 * F_], preferred_element_type=jnp.float32)
                 + jnp.dot(ad, w[2 * F_:3 * F_], preferred_element_type=jnp.float32)
                 + jnp.dot(mu, w[3 * F_:4 * F_], preferred_element_type=jnp.float32)
                 + bfc0_ref[...])                   # [bt, 1]

        # Dropout(p=0.0) is identity.  Lane-dense unmasked store; the wrapper
        # slices column 0 outside the kernel.
        out_ref[...] = jnp.broadcast_to(logit, out_ref.shape).astype(out_ref.dtype)


def _pick_hw_tile(HW, row_bytes, max_block_bytes=4 << 20):
    """Largest multiple-of-128 divisor of HW whose x-block stays <= budget."""
    if HW % 128 != 0:
        return HW                       # full-extent block (valid BlockSpec)
    cap = max(128, max_block_bytes // max(row_bytes, 1))
    best, t = 128, 128
    while t <= HW:
        if HW % t == 0 and t <= cap:
            best = t
        t += 128
    return best


@jax.jit
def diff_model_forward(x, wb, bb, wfc, bfc):
    """x: [B, 2, C, H, W] f32 -> [B] f32 (DiffModel fc output, class column 0)."""
    B, two, C, H, W = x.shape
    assert two == 2
    HW = H * W
    F_ = wb.shape[1]

    # Contiguous (free) reshape -- NO transpose, no extra HBM pass over x.
    x3 = x.reshape(B, 2 * C, HW)
    # Fold the global-average-pool's 1/HW into the tiny backbone weight.
    wbs = wb * (1.0 / HW)
    # Only fc class column 0 is ever used (forward returns fc(...)[:, 0]).
    wfc0 = wfc[:, 0:1]
    bfc0 = bfc[:, 0:1]

    # Tiling: batch tiles on the "parallel" grid axis (megacore split on v7x),
    # HW tiles on the trailing "arbitrary" reduction axis.
    b_tile = 128 if (B > 128 and B % 128 == 0) else B
    hw_tile = _pick_hw_tile(HW, row_bytes=b_tile * 2 * C * x3.dtype.itemsize)
    grid = (B // b_tile, HW // hw_tile)

    out_pad = 128  # lane-dense output row; column 0 sliced outside

    cost = pl.CostEstimate(
        flops=int(2 * B * 2 * C * HW            # spatial-sum adds
                  + 2 * 2 * B * C * F_          # two backbone matmuls
                  + 2 * B * 4 * F_              # fc column 0
                  + 8 * B * F_),                # elementwise feature combo
        transcendentals=0,
        bytes_accessed=int(4 * (x3.size + wbs.size + bb.size + wfc0.size
                                + bfc0.size + B * out_pad)),
    )

    out = pl.pallas_call(
        diffmodel_kernel,
        out_shape=jax.ShapeDtypeStruct((B, out_pad), jnp.float32),
        grid_spec=pltpu.PrefetchScalarGridSpec(
            num_scalar_prefetch=0,
            grid=grid,
            in_specs=[
                pl.BlockSpec((b_tile, 2 * C, hw_tile), lambda i, k: (i, 0, k)),
                pl.BlockSpec(wbs.shape, lambda i, k: (0, 0)),   # resident weights
                pl.BlockSpec(bb.shape, lambda i, k: (0, 0)),
                pl.BlockSpec(wfc0.shape, lambda i, k: (0, 0)),
                pl.BlockSpec(bfc0.shape, lambda i, k: (0, 0)),
            ],
            out_specs=pl.BlockSpec((b_tile, out_pad), lambda i, k: (i, 0)),
            scratch_shapes=[pltpu.VMEM((b_tile, 2 * C), jnp.float32)],
        ),
        compiler_params=pltpu.CompilerParams(
            dimension_semantics=("parallel", "arbitrary")),
        cost_estimate=cost,
    )(x3, wbs, bb, wfc0, bfc0)
    return out[:, 0]


def reference_forward(x, wb, bb, wfc, bfc):
    """Pure-JAX reference mirroring DiffModel.forward_train semantics."""
    B, _, C, H, W = x.shape
    pooled = x.reshape(B, 2, C, H * W).mean(-1)          # [B, 2, C]
    feats = pooled @ wb + bb                             # [B, 2, F]
    feat1, feat2 = feats[:, 0], feats[:, 1]
    l1 = jnp.abs(feat1 - feat2)
    l2 = l1 ** 2
    ad = feat1 + feat2
    mu = feat1 * feat2
    cat = jnp.concatenate([l1, l2, ad, mu], axis=1)      # [B, 4F]
    return (cat @ wfc + bfc)[:, 0]


if __name__ == "__main__":
    # Small shapes consistent with the module: x[:, 0] / x[:, 1] are NCHW images.
    B, C, H, W = 2, 4, 16, 16
    dim_feats = 32
    num_classes = 3

    key = jax.random.PRNGKey(0)
    kx, kwb, kbb, kwfc, kbfc = jax.random.split(key, 5)

    x = jax.random.normal(kx, (B, 2, C, H, W), dtype=jnp.float32)
    # synthetic backbone projection weights
    wb = jax.random.normal(kwb, (C, dim_feats), dtype=jnp.float32) * 0.1
    bb = jax.random.normal(kbb, (1, dim_feats), dtype=jnp.float32) * 0.1
    # fc: Linear(4 * dim_feats, num_classes)
    wfc = jax.random.normal(kwfc, (4 * dim_feats, num_classes), dtype=jnp.float32) * 0.1
    bfc = jax.random.normal(kbfc, (1, num_classes), dtype=jnp.float32) * 0.1

    out = jax.block_until_ready(diff_model_forward(x, wb, bb, wfc, bfc))
    expected = reference_forward(x, wb, bb, wfc, bfc)
    assert out.shape == (B,)
    assert jnp.allclose(out, expected, atol=1e-4, rtol=1e-4), (out, expected)
    print("KERNEL_OK")
</pallas_src>

<mosaic_0001>
module attributes {stable_mosaic.version = 11 : i64} {
  func.func @diffmodel_kernel(%arg0: i32, %arg1: i32, %arg2: memref<2x8x256xf32, #tpu.memory_space<vmem>>, %arg3: memref<4x32xf32, #tpu.memory_space<vmem>>, %arg4: memref<1x32xf32, #tpu.memory_space<vmem>>, %arg5: memref<128x1xf32, #tpu.memory_space<vmem>>, %arg6: memref<1x1xf32, #tpu.memory_space<vmem>>, %arg7: memref<2x128xf32, #tpu.memory_space<vmem>>, %arg8: memref<2x8xf32, #tpu.memory_space<vmem>>) attributes {dimension_semantics = [#tpu.dimension_semantics<parallel>, #tpu.dimension_semantics<arbitrary>], iteration_bounds = array<i64: 1, 1>, scalar_prefetch = 0 : i64, scratch_operands = 1 : i64, tpu.core_type = #tpu.core_type<tc>, window_params = [{transform_indices = @transform_0, window_bounds = array<i64: 2, 8, 256>}, {pipeline_mode = #tpu.pipeline_mode<synchronous>, transform_indices = @transform_1, window_bounds = array<i64: 4, 32>}, {pipeline_mode = #tpu.pipeline_mode<synchronous>, transform_indices = @transform_2, window_bounds = array<i64: 1, 32>}, {pipeline_mode = #tpu.pipeline_mode<synchronous>, transform_indices = @transform_3, window_bounds = array<i64: 128, 1>}, {pipeline_mode = #tpu.pipeline_mode<synchronous>, transform_indices = @transform_4, window_bounds = array<i64: 1, 1>}, {transform_indices = @transform_5, window_bounds = array<i64: 2, 128>}]} {
    %c0_i32 = arith.constant 0 : i32
    %0 = arith.cmpi eq, %arg1, %c0_i32 : i32
    %1 = arith.extui %0 : i1 to i32
    %c0_i32_0 = arith.constant 0 : i32
    %2 = arith.cmpi ne, %1, %c0_i32_0 : i32
    scf.if %2 {
      %cst_9 = arith.constant 0.000000e+00 : f32
      %11 = vector.broadcast %cst_9 : f32 to vector<2x8xf32>
      %c0_10 = arith.constant 0 : index
      %c0_11 = arith.constant 0 : index
      %12 = vector.load %arg8[%c0_10, %c0_11] : memref<2x8xf32, #tpu.memory_space<vmem>>, vector<2x8xf32>
      tpu.vector_store %arg8[%c0_10, %c0_11], %11 {strides = array<i32>} : memref<2x8xf32, #tpu.memory_space<vmem>>, vector<2x8xf32>,
    } else {
    }
    %c0 = arith.constant 0 : index
    %c0_1 = arith.constant 0 : index
    %3 = vector.load %arg8[%c0, %c0_1] : memref<2x8xf32, #tpu.memory_space<vmem>>, vector<2x8xf32>
    %c0_2 = arith.constant 0 : index
    %c0_3 = arith.constant 0 : index
    %c0_4 = arith.constant 0 : index
    %4 = vector.load %arg2[%c0_2, %c0_3, %c0_4] : memref<2x8x256xf32, #tpu.memory_space<vmem>>, vector<2x8x256xf32>
    %cst = arith.constant dense<0.000000e+00> : vector<2x8xf32>
    %5 = vector.multi_reduction <add>, %4, %cst [2] : vector<2x8x256xf32> to vector<2x8xf32>
    %6 = arith.addf %3, %5 : vector<2x8xf32>
    %c0_5 = arith.constant 0 : index
    %c0_6 = arith.constant 0 : index
    %7 = vector.load %arg8[%c0_5, %c0_6] : memref<2x8xf32, #tpu.memory_space<vmem>>, vector<2x8xf32>
    tpu.vector_store %arg8[%c0_5, %c0_6], %6 {strides = array<i32>} : memref<2x8xf32, #tpu.memory_space<vmem>>, vector<2x8xf32>,
    %c0_i32_7 = arith.constant 0 : i32
    %8 = arith.cmpi eq, %arg1, %c0_i32_7 : i32
    %9 = arith.extui %8 : i1 to i32
    %c0_i32_8 = arith.constant 0 : i32
    %10 = arith.cmpi ne, %9, %c0_i32_8 : i32
    scf.if %10 {
      %c0_9 = arith.constant 0 : index
      %c0_10 = arith.constant 0 : index
      %11 = vector.load %arg8[%c0_9, %c0_10] : memref<2x8xf32, #tpu.memory_space<vmem>>, vector<2x8xf32>
      %12 = vector.extract_strided_slice %11 {offsets = [0, 0], sizes = [2, 4], strides = [1, 1]} : vector<2x8xf32> to vector<2x4xf32>
      %c0_11 = arith.constant 0 : index
      %c0_12 = arith.constant 0 : index
      %13 = vector.load %arg3[%c0_11, %c0_12] : memref<4x32xf32, #tpu.memory_space<vmem>>, vector<4x32xf32>
      %cst_13 = arith.constant dense<0.000000e+00> : vector<2x32xf32>
      %14 = tpu.matmul %12, %13, %cst_13 {dimension_numbers = #tpu.dot_dimension_numbers<[1], [0], [0], [1], [0, 0, 1, 1], [], []>} : vector<2x4xf32>, vector<4x32xf32>, vector<2x32xf32> -> vector<2x32xf32>
      %c0_14 = arith.constant 0 : index
      %c0_15 = arith.constant 0 : index
      %15 = vector.load %arg4[%c0_14, %c0_15] : memref<1x32xf32, #tpu.memory_space<vmem>>, vector<1x32xf32>
      %16 = vector.broadcast %15 : vector<1x32xf32> to vector<2x32xf32>
      %17 = arith.addf %14, %16 : vector<2x32xf32>
      %18 = vector.extract_strided_slice %11 {offsets = [0, 4], sizes = [2, 4], strides = [1, 1]} : vector<2x8xf32> to vector<2x4xf32>
      %c0_16 = arith.constant 0 : index
      %c0_17 = arith.constant 0 : index
      %19 = vector.load %arg3[%c0_16, %c0_17] : memref<4x32xf32, #tpu.memory_space<vmem>>, vector<4x32xf32>
      %cst_18 = arith.constant dense<0.000000e+00> : vector<2x32xf32>
      %20 = tpu.matmul %18, %19, %cst_18 {dimension_numbers = #tpu.dot_dimension_numbers<[1], [0], [0], [1], [0, 0, 1, 1], [], []>} : vector<2x4xf32>, vector<4x32xf32>, vector<2x32xf32> -> vector<2x32xf32>
      %c0_19 = arith.constant 0 : index
      %c0_20 = arith.constant 0 : index
      %21 = vector.load %arg4[%c0_19, %c0_20] : memref<1x32xf32, #tpu.memory_space<vmem>>, vector<1x32xf32>
      %22 = vector.broadcast %21 : vector<1x32xf32> to vector<2x32xf32>
      %23 = arith.addf %20, %22 : vector<2x32xf32>
      %24 = arith.subf %17, %23 : vector<2x32xf32>
      %25 = math.absf %24 : vector<2x32xf32>
      %26 = arith.mulf %25, %25 : vector<2x32xf32>
      %27 = arith.addf %17, %23 : vector<2x32xf32>
      %28 = arith.mulf %17, %23 : vector<2x32xf32>
      %c0_21 = arith.constant 0 : index
      %c0_22 = arith.constant 0 : index
      %29 = vector.load %arg5[%c0_21, %c0_22] : memref<128x1xf32, #tpu.memory_space<vmem>>, vector<128x1xf32>
      %30 = vector.extract_strided_slice %29 {offsets = [0, 0], sizes = [32, 1], strides = [1, 1]} : vector<128x1xf32> to vector<32x1xf32>
      %cst_23 = arith.constant dense<0.000000e+00> : vector<2x1xf32>
      %31 = tpu.matmul %25, %30, %cst_23 {dimension_numbers = #tpu.dot_dimension_numbers<[1], [0], [0], [1], [0, 0, 1, 1], [], []>} : vector<2x32xf32>, vector<32x1xf32>, vector<2x1xf32> -> vector<2x1xf32>
      %32 = vector.extract_strided_slice %29 {offsets = [32, 0], sizes = [32, 1], strides = [1, 1]} : vector<128x1xf32> to vector<32x1xf32>
      %cst_24 = arith.constant dense<0.000000e+00> : vector<2x1xf32>
      %33 = tpu.matmul %26, %32, %cst_24 {dimension_numbers = #tpu.dot_dimension_numbers<[1], [0], [0], [1], [0, 0, 1, 1], [], []>} : vector<2x32xf32>, vector<32x1xf32>, vector<2x1xf32> -> vector<2x1xf32>
      %34 = arith.addf %31, %33 : vector<2x1xf32>
      %35 = vector.extract_strided_slice %29 {offsets = [64, 0], sizes = [32, 1], strides = [1, 1]} : vector<128x1xf32> to vector<32x1xf32>
      %cst_25 = arith.constant dense<0.000000e+00> : vector<2x1xf32>
      %36 = tpu.matmul %27, %35, %cst_25 {dimension_numbers = #tpu.dot_dimension_numbers<[1], [0], [0], [1], [0, 0, 1, 1], [], []>} : vector<2x32xf32>, vector<32x1xf32>, vector<2x1xf32> -> vector<2x1xf32>
      %37 = arith.addf %34, %36 : vector<2x1xf32>
      %38 = vector.extract_strided_slice %29 {offsets = [96, 0], sizes = [32, 1], strides = [1, 1]} : vector<128x1xf32> to vector<32x1xf32>
      %cst_26 = arith.constant dense<0.000000e+00> : vector<2x1xf32>
      %39 = tpu.matmul %28, %38, %cst_26 {dimension_numbers = #tpu.dot_dimension_numbers<[1], [0], [0], [1], [0, 0, 1, 1], [], []>} : vector<2x32xf32>, vector<32x1xf32>, vector<2x1xf32> -> vector<2x1xf32>
      %40 = arith.addf %37, %39 : vector<2x1xf32>
      %c0_27 = arith.constant 0 : index
      %c0_28 = arith.constant 0 : index
      %41 = vector.load %arg6[%c0_27, %c0_28] : memref<1x1xf32, #tpu.memory_space<vmem>>, vector<1x1xf32>
      %42 = vector.broadcast %41 : vector<1x1xf32> to vector<2x1xf32>
      %43 = arith.addf %40, %42 : vector<2x1xf32>
      %44 = vector.shape_cast %43 : vector<2x1xf32> to vector<2x1xf32>
      %45 = vector.broadcast %44 : vector<2x1xf32> to vector<2x128xf32>
      %c0_29 = arith.constant 0 : index
      %c0_30 = arith.constant 0 : index
      %46 = vector.load %arg7[%c0_29, %c0_30] : memref<2x128xf32, #tpu.memory_space<vmem>>, vector<2x128xf32>
      tpu.vector_store %arg7[%c0_29, %c0_30], %45 {strides = array<i32>} : memref<2x128xf32, #tpu.memory_space<vmem>>, vector<2x128xf32>,
    } else {
    }
    return
  }
  func.func @transform_0(%arg0: i32, %arg1: i32) -> (i32, i32, i32) {
    %c0_i32 = arith.constant 0 : i32
    %c0_i32_0 = arith.constant 0 : i32
    return %arg0, %c0_i32, %arg1 : i32, i32, i32
  }
  func.func @transform_1(%arg0: i32, %arg1: i32) -> (i32, i32) {
    %c0_i32 = arith.constant 0 : i32
    %c0_i32_0 = arith.constant 0 : i32
    %c0_i32_1 = arith.constant 0 : i32
    return %c0_i32, %c0_i32_0 : i32, i32
  }
  func.func @transform_2(%arg0: i32, %arg1: i32) -> (i32, i32) {
    %c0_i32 = arith.constant 0 : i32
    %c0_i32_0 = arith.constant 0 : i32
    %c0_i32_1 = arith.constant 0 : i32
    return %c0_i32, %c0_i32_0 : i32, i32
  }
  func.func @transform_3(%arg0: i32, %arg1: i32) -> (i32, i32) {
    %c0_i32 = arith.constant 0 : i32
    %c0_i32_0 = arith.constant 0 : i32
    %c0_i32_1 = arith.constant 0 : i32
    return %c0_i32, %c0_i32_0 : i32, i32
  }
  func.func @transform_4(%arg0: i32, %arg1: i32) -> (i32, i32) {
    %c0_i32 = arith.constant 0 : i32
    %c0_i32_0 = arith.constant 0 : i32
    %c0_i32_1 = arith.constant 0 : i32
    return %c0_i32, %c0_i32_0 : i32, i32
  }
  func.func @transform_5(%arg0: i32, %arg1: i32) -> (i32, i32) {
    %c0_i32 = arith.constant 0 : i32
    %c0_i32_0 = arith.constant 0 : i32
    return %arg0, %c0_i32 : i32, i32
  }
}

</mosaic_0001>

<bundles_post_ra>
// kernel: diff_model_forward.1
= control target key start
LH: loop header
LB: loop body
LE: loop exit
PB: predicated region body
PF: predicated region fallthrough
CT: control target
= control target key end

     0   :  { %vm26_vm0 = vcmask 58368   ;;  %v674_v6 = vmov 0.0   ;;  %vm73_vm1 = vcmask 1043456   ;;  %vm675_vm2 = vmmov 0   ;;  %s802_s0 = inlined_call_operand.vmem [shape: f32[2,8,256], index: 0, kind: input, shape index: {}]   ;;  %s803_s1 = inlined_call_operand.vmem [shape: f32[4,32], index: 1, kind: input, shape index: {}]   ;;  %s804_s3 = inlined_call_operand.vmem [shape: f32[128,1], index: 3, kind: input, shape index: {}]   ;;  %s805_s2 = inlined_call_operand.vmem [shape: f32[1,32], index: 2, kind: input, shape index: {}]   ;;  %s806_s4 = inlined_call_operand.<no memory space> [shape: f32[1,1], index: 4, kind: input, shape index: {}]   ;;  %s807_s5 = inlined_call_operand.vmem [shape: f32[2,128], index: 5, kind: output, shape index: {}]  }
   0x1   :  { %v29_v0 = vld [vmem:[%s802_s0] sm:$0xff]  ;;  %v30_v1 = vld [vmem:[%s802_s0 + $0x8] sm:$0xff]  ;;  %v31_v2 = vld [vmem:[%s802_s0 + $0x10] sm:$0xff]  ;;  %27 = vst.msk [vmem:[#allocation2] sm:$0x3] %vm26_vm0, %v674_v6  ;;  %589 = vmatprep.subr.mxu0 %v674_v6  ;;  %594 = vmatprep.subr.mxu1 %v674_v6  ;;  %v41_v8 = vlaneseq  ;;  %vm51_vm3 = vcmask 1041409   ;;  %v10_v58 = vstv %s806_s4 }
   0x2   :  { %v33_v3 = vadd.f32 %v30_v1, %v29_v0  ;;  %v32_v4 = vld [vmem:[%s802_s0 + $0x18] sm:$0xff]  ;;  %v61_v7 = vld [vmem:[%s803_s1] sm:$0xf]  ;;  %591 = vmatprep.mubr.msk.f32.mxu0 %vm675_vm2, %v674_v6  ;;  %596 = vmatprep.mubr.msk.f32.mxu1 %vm675_vm2, %v674_v6  ;;  %vm69_vm4 = vcmask 31744   ;;  %s676_s0 = smov 124   ;;  %v677_v20 = vmov 0.0|0.0  }
   0x3   :  { %v36_v5 = vadd.f32 %v32_v4, %v31_v2  ;;  %590 = vmatpush3.msk.msra.mxu0 %vm73_vm1, %v61_v7  ;;  %595 = vmatpush3.msk.msra.mxu1 %vm73_vm1, %v61_v7  ;;  %v42_v9 = vand.u32 127, %v41_v8  ;;  %v44_v10 = vshrl.u32 %v41_v8, 7  ;;  %v226_v21 = vld [vmem:[%s804_s3] sm:$0xff]  ;;  %v227_v22 = vld [vmem:[%s804_s3 + $0x8] sm:$0xff]  ;;  %v228_v28 = vld [vmem:[%s804_s3 + $0x10] sm:$0xff]  ;;  %vm242_vm5 = vcmask 261120  }
   0x4   :  { %34 = vadd.xlane.f32.xlu0 %v33_v3  ;;  %649 = vmatprep.subr.bf16.mxu1 %v677_v20  ;;  %v650_v23 = vpack.c.bf16 %v227_v22, %v226_v21  ;;  %v230_v25 = vld [vmem:[%s804_s3 + $0x20] sm:$0xff]  ;;  %v231_v26 = vld [vmem:[%s804_s3 + $0x28] sm:$0xff]  ;;  %v229_v29 = vld [vmem:[%s804_s3 + $0x18] sm:$0xff]  ;;  %11 = vst [vmem:[#allocation3] sm:$0x1] %v10_v58  ;;  %v678_v59 = vmov 0  }
   0x5   :  { %v45_v12 = vsub.s32 %v42_v9, %v44_v10  ;;  %643 = vmatprep.subr.bf16.mxu0 %v677_v20  ;;  %v644_v27 = vpack.c.bf16 %v231_v26, %v230_v25  ;;  %v653_v30 = vpack.c.bf16 %v229_v29, %v228_v28  ;;  %v232_v31 = vld [vmem:[%s804_s3 + $0x30] sm:$0xff]  ;;  %v233_v32 = vld [vmem:[%s804_s3 + $0x38] sm:$0xff]  ;;  %v555_v36 = vld [vmem:[%s805_s2] ss:$0 sm:$0xff]  ;;  %672 = vset.pattern.permute.xlu1 %v678_v59 }
   0x6   :  { %v647_v33 = vpack.c.bf16 %v233_v32, %v232_v31  ;;  %v238_v41 = vld [vmem:[%s804_s3 + $0x60] sm:$0xff]  ;;  %v239_v42 = vld [vmem:[%s804_s3 + $0x68] sm:$0xff]  ;;  %v240_v50 = vld [vmem:[%s804_s3 + $0x70] sm:$0xff]  ;;  %673 = vset.pattern.permute.xlu0 %v678_v59 }
   0x7   :  { %v234_v46 = vld [vmem:[%s804_s3 + $0x40] sm:$0xff]  ;;  %v235_v47 = vld [vmem:[%s804_s3 + $0x48] sm:$0xff]  ;;  %v662_v48 = vpack.c.bf16 %v239_v42, %v238_v41  ;;  %v241_v51 = vld [vmem:[%s804_s3 + $0x78] sm:$0xff] }
   0x8   :  { %37 = vadd.xlane.f32.xlu0 %v36_v5  ;;  %v28_v15 = vld [vmem:[#allocation2] sm:$0x3]  ;;  %v656_v52 = vpack.c.bf16 %v235_v47, %v234_v46  ;;  %v236_v54 = vld [vmem:[%s804_s3 + $0x50] sm:$0xff]  ;;  %v237_v55 = vld [vmem:[%s804_s3 + $0x58] sm:$0xff]  ;;  %v665_v56 = vpack.c.bf16 %v241_v51, %v240_v50 }
   0x9   :  { %v659_v57 = vpack.c.bf16 %v237_v55, %v236_v54 }
  0x91   :  { %v35_v11 = vpop.xlane.xlu0 %34 }
  0x92   :  { %v46_v14 = vrot.slane %v35_v11, %v45_v12 }
  0x95   :  { %v38_v13 = vpop.xlane.xlu0 %37 }
  0x96   :  { %v50_v16 = vrot.slane %v38_v13, %v45_v12 }
  0x98   :  { %v52_v17 = vsel %vm51_vm3, %v50_v16, %v46_v14 }
  0x99   :  { %v54_v18 = vadd.f32 %v52_v17, %v28_v15 }
  0x9b   :  { %56 = vst.msk [vmem:[#allocation2] sm:$0x3] %vm26_vm0, %v54_v18 }
  0xa2   :  { %v60_v19 = vld [vmem:[#allocation2] sm:$0x3] }
  0xa3   :  { %147 = vrot.lane.b32.xlu1 %v60_v19, %s676_s0  ;;  %592 = vmatmul.mubr.msk.f32.vlgmr.msra.gmra.mrb[0].mxu0 %vm69_vm4, %v60_v19 }
  0xa4   :  { %607 = vmatprep.mubr.msk.f32.mxu0 %vm675_vm2, %v674_v6  ;;  %645 = vmatpush3.bf16.msra.mxu0 %v644_v27 }
  0xa5   :  { %646 = vmatprep.subr.bf16.mxu0 %v677_v20 }
  0xa8   :  { %648 = vmatpush3.bf16.msra.mxu0 %v647_v33 }
  0xa9   :  { %655 = vmatprep.subr.bf16.mxu0 %v677_v20 }
 0x115   :  { %v148_v24 = vpop.permute.xlu1 %147 }
 0x116   :  { %597 = vmatmul.mubr.msk.f32.vlgmr.msra.gmra.mrb[0].mxu1 %vm69_vm4, %v148_v24 }
 0x117   :  { %651 = vmatpush3.bf16.msra.mxu1 %v650_v23  ;;  %618 = vmatprep.mubr.msk.f32.mxu1 %vm675_vm2, %v674_v6 }
 0x118   :  { %652 = vmatprep.subr.bf16.mxu1 %v677_v20 }
 0x11b   :  { %654 = vmatpush3.bf16.msra.mxu1 %v653_v30 }
 0x11c   :  { %661 = vmatprep.subr.bf16.mxu1 %v677_v20 }
 0x176   :  { %v143_v34 = vpop.f32.mrb[0].mxu0 }
 0x177   :  { %v593_v35 = vpop.f32.mrb[1].mxu0  ;;  %v144_v38 = vadd.f32 %v555_v36, %v143_v34 }
 0x1e9   :  { %v217_v37 = vpop.f32.mrb[0].mxu1 }
 0x1ea   :  { %v218_v39 = vadd.f32 %v555_v36, %v217_v37  ;;  %v598_v40 = vpop.f32.mrb[1].mxu1 }
 0x1ec   :  { %v221_v43 = vsub.f32 %v144_v38, %v218_v39  ;;  %v224_v44 = vadd.f32 %v218_v39, %v144_v38  ;;  %v225_v45 = vmul.f32 %v218_v39, %v144_v38 }
 0x1ee   :  { %v222_v49 = vand.u32 2147483647, %v221_v43 }
 0x1f0   :  { %v223_v53 = vmul.f32 %v222_v49, %v222_v49  ;;  %619 = vmatmul.mubr.msk.f32.vlgmr.msra.gmra.mrb[2].mxu1 %vm242_vm5, %v222_v49 }
 0x1f1   :  { %663 = vmatpush3.bf16.msra.mxu1 %v662_v48  ;;  %640 = vmatprep.mubr.msk.f32.mxu1 %vm675_vm2, %v674_v6 }
 0x1f2   :  { %608 = vmatmul.mubr.msk.f32.vlgmr.msra.gmra.mrb[2].mxu0 %vm242_vm5, %v223_v53  ;;  %664 = vmatprep.subr.bf16.mxu1 %v677_v20 }
 0x1f3   :  { %657 = vmatpush3.bf16.msra.mxu0 %v656_v52  ;;  %629 = vmatprep.mubr.msk.f32.mxu0 %vm675_vm2, %v674_v6  ;;  %v564_v6 = vld [vmem:[#allocation3] ss:$0 sm:$0xff] }
 0x1f4   :  { %658 = vmatprep.subr.bf16.mxu0 %v677_v20 }
 0x1f5   :  { %666 = vmatpush3.bf16.msra.mxu1 %v665_v56 }
 0x1f7   :  { %660 = vmatpush3.bf16.msra.mxu0 %v659_v57 }
 0x1f8   :  { %641 = vmatmul.mubr.msk.f32.vlgmr.msra.gmra.mrb[4].mxu1 %vm242_vm5, %v225_v45 }
 0x1fa   :  { %630 = vmatmul.mubr.msk.f32.vlgmr.msra.gmra.mrb[4].mxu0 %vm242_vm5, %v224_v44 }
 0x2c3   :  { %v385_v60 = vpop.f32.mrb[2].mxu1 }
 0x2c4   :  { %v620_v61 = vpop.f32.mrb[3].mxu1 }
 0x2c5   :  { %v312_v62 = vpop.f32.mrb[2].mxu0 }
 0x2c6   :  { %v386_v63 = vadd.f32 %v385_v60, %v312_v62  ;;  %v609_v0 = vpop.f32.mrb[3].mxu0 }
 0x2cb   :  { %v532_v1 = vpop.f32.mrb[4].mxu1 }
 0x2cc   :  { %v642_v2 = vpop.f32.mrb[5].mxu1 }
 0x2cd   :  { %v458_v3 = vpop.f32.mrb[4].mxu0 }
 0x2ce   :  { %v462_v4 = vadd.f32 %v458_v3, %v386_v63  ;;  %v631_v5 = vpop.f32.mrb[5].mxu0 }
 0x2d0   :  { %v536_v7 = vadd.f32 %v532_v1, %v462_v4 }
 0x2d2   :  { %v544_v8 = vadd.f32 %v564_v6, %v536_v7 }
 0x2d4   :  { %547 = vperm.xlu1 %672, %v544_v8  }
 0x353   :  { %v548_v9 = vpop.permute.xlu1 %547 }
 0x354   :  { %550 = vst [vmem:[%s807_s5] sm:$0x3] %v548_v9 }

</bundles_post_ra>
